<compile_context>
chip_gen: v7x
topology: tpu7x:2x2x1
jax: 0.10.0
libtpu: 0.0.40
codegen_flags: <defaults>
</compile_context>

<pallas_src>
import functools

import jax
import jax.numpy as jnp
from jax.experimental import pallas as pl
from jax.experimental.pallas import tpu as pltpu


def _round_up(x: int, m: int) -> int:
    return ((x + m - 1) // m) * m


def _nll_partial_kernel(logits_ref, tags_ref, out_ref, *, n_valid, tile):
    """One tile of positions: write this block's summed NLL into out lane 0."""
    i = pl.program_id(0)

    x = logits_ref[...].astype(jnp.float32)      # (T, tile): tags x positions
    tags = tags_ref[...]                         # (1, tile) int32
    t, n = x.shape

    # Validity of the ragged tail, computed from the static position count
    # (no HBM `valid` stream).  Only the last grid block can have invalid lanes.
    pos = i * tile + jax.lax.broadcasted_iota(jnp.int32, (1, n), 1)   # (1, n)
    valid = pos < n_valid

    # Sanitize tail lanes BEFORE max/exp: their VMEM contents are undefined
    # (clipped DMA) and Inf/NaN there would survive masking (Inf*0 = NaN).
    x = jnp.where(valid, x, 0.0)

    # Numerically stable log-sum-exp over the tag (sublane) axis.
    m = jnp.max(x, axis=0, keepdims=True)                               # (1, n)
    lse = m + jnp.log(jnp.sum(jnp.exp(x - m), axis=0, keepdims=True))   # (1, n)

    # Fused one-hot gather of the target logit: (T, 1) iota broadcast against
    # the (1, n) tags row; no (T, n) iota or log-prob temporary materialized.
    tag_iota = jax.lax.broadcasted_iota(jnp.int32, (t, 1), 0)
    tgt = jnp.sum(jnp.where(tag_iota == tags, x, 0.0), axis=0, keepdims=True)

    # Per-position NLL, tail masked, reduced to this block's partial sum.
    partial = jnp.sum(jnp.where(valid, lse - tgt, 0.0))

    # One lane-dense (1, 128) output block per grid step; partial sits at lane 0
    # (rest zeros), the wrapper just sums everything.
    lane = jax.lax.broadcasted_iota(jnp.int32, (1, 128), 1)
    out_ref[...] = jnp.where(lane == 0, partial, 0.0)


def _nll_sum_lane_dense(logits_tn, tags_row, *, tile_n=32768):
    """Total log-softmax NLL over all positions; logits already (n_tags, N)."""
    t_dim, n_pos = logits_tn.shape

    # ---- position-tile selection (the knob to sweep is tile_n) -------------
    tile = max(128, (int(tile_n) // 128) * 128)
    # Keep >= 2 grid blocks whenever possible so both v7x TensorCores stream
    # concurrently (grid axis is "parallel"); harmless on 1-TC v5e/v6e.
    tile = min(tile, _round_up(pl.cdiv(n_pos, 2), 128))
    # Keep the double-buffered input streams within a conservative VMEM budget
    # (logits block sublane-pads to a multiple of 8 rows, tags row pads to 8).
    rows = _round_up(max(t_dim, 8), 8)
    per_pos_bytes = (rows + 8) * 4 * 2           # logits + tags, double-buffered
    vmem_budget = 12 * 1024 * 1024
    tile = min(tile, max(128, (vmem_budget // per_pos_bytes) // 128 * 128))

    num_blocks = pl.cdiv(n_pos, tile)

    kernel = functools.partial(_nll_partial_kernel, n_valid=n_pos, tile=tile)
    partials = pl.pallas_call(
        kernel,
        out_shape=jax.ShapeDtypeStruct((1, num_blocks * 128), jnp.float32),
        grid_spec=pltpu.PrefetchScalarGridSpec(
            num_scalar_prefetch=0,
            grid=(num_blocks,),
            in_specs=[
                pl.BlockSpec((t_dim, tile), lambda i: (0, i)),   # logits tile
                pl.BlockSpec((1, tile), lambda i: (0, i)),       # tags tile
            ],
            out_specs=pl.BlockSpec((1, 128), lambda i: (0, i)),
        ),
        compiler_params=pltpu.CompilerParams(
            dimension_semantics=("parallel",),
            vmem_limit_bytes=48 * 1024 * 1024,   # above v5e's 16 MiB default
        ),
    )(logits_tn, tags_row)

    # Each block's partial sits at lane 0 of its 128-lane slot; rest are zeros.
    return jnp.sum(partials)


def rule_sequence_labeler_loss(logits, mask, tags, *, tile_n=32768):
    """Forward of RuleSequenceLabeler (== SequenceLabeler._compute_loss).

    logits: (B, S, T) float32/bfloat16; mask: (B, S); tags: (B, S) int in [0, T).
    Returns scalar float32 loss
        = -sum_{b,s} log_softmax(logits)[b, s, tags[b, s]] / B
    (mathematically identical to masked_log_softmax + gather + sum / B, since
    the mask term is constant along the softmax axis and cancels).
    """
    del mask  # constant along the tag axis -> cancels inside log_softmax
    B, S, T = logits.shape
    N = B * S
    # Lane-dense presentation: the reshape is free (contiguous); the transpose
    # costs one extra XLA pass over logits in HBM (see module header / the _tn
    # entry point below for the zero-copy alternative).
    logits_tn = logits.reshape(N, T).T                      # (T, N)
    tags_row = tags.reshape(1, N).astype(jnp.int32)         # (1, N)
    nll = _nll_sum_lane_dense(logits_tn, tags_row, tile_n=tile_n)
    return nll / jnp.float32(B)


def rule_sequence_labeler_loss_tn(logits_tn, tags, batch_size, *, tile_n=32768):
    """Same loss, but takes logits already laid out as (n_tags, B*S) so no extra
    HBM transpose pass is needed (preferred when the producer can emit it)."""
    n_pos = logits_tn.shape[1]
    tags_row = tags.reshape(1, n_pos).astype(jnp.int32)
    nll = _nll_sum_lane_dense(logits_tn, tags_row, tile_n=tile_n)
    return nll / jnp.float32(batch_size)


def _reference_loss(logits, mask, tags):
    """Pure-JAX mirror of the PyTorch forward (mask cancels, divisor = B)."""
    del mask
    logp = jax.nn.log_softmax(logits.astype(jnp.float32), axis=-1)
    gathered = jnp.take_along_axis(
        logp, tags[..., None].astype(jnp.int32), axis=-1)[..., 0]
    return -jnp.sum(gathered) / jnp.float32(logits.shape[0])


if __name__ == "__main__":
    key = jax.random.PRNGKey(0)
    k1, k2, k3, k4 = jax.random.split(key, 4)

    loss_fn = jax.jit(rule_sequence_labeler_loss, static_argnames=("tile_n",))

    # Case 1: multi-block grid (N = 2048 positions -> 2 parallel 1024-lane tiles).
    B, S, T = 4, 512, 8
    logits = jax.random.normal(k1, (B, S, T), dtype=jnp.float32)
    tags = jax.random.randint(k2, (B, S), 0, T, dtype=jnp.int32)
    lens = jax.random.randint(k3, (B,), S // 2, S + 1, dtype=jnp.int32)
    mask = (jnp.arange(S)[None, :] < lens[:, None]).astype(jnp.float32)

    loss = jax.block_until_ready(loss_fn(logits, mask, tags))
    ref = _reference_loss(logits, mask, tags)
    assert jnp.allclose(loss, ref, rtol=2e-4, atol=1e-4), (loss, ref)

    # Pre-transposed (n_tags, B*S) entry point gives the same value.
    loss_tn = jax.block_until_ready(
        rule_sequence_labeler_loss_tn(logits.reshape(-1, T).T, tags, B))
    assert jnp.allclose(loss_tn, ref, rtol=2e-4, atol=1e-4), (loss_tn, ref)

    # Case 2: ragged sizes (n_tags < 8 sublanes, 300 positions -> 2 blocks of 256
    # with a garbage-padded tail masked in-kernel; no wrapper-side padding).
    B2, S2, T2 = 3, 100, 5
    logits2 = jax.random.normal(k4, (B2, S2, T2), dtype=jnp.float32)
    tags2 = jax.random.randint(k2, (B2, S2), 0, T2, dtype=jnp.int32)
    mask2 = jnp.ones((B2, S2), dtype=jnp.float32)

    loss2 = jax.block_until_ready(loss_fn(logits2, mask2, tags2))
    ref2 = _reference_loss(logits2, mask2, tags2)
    assert jnp.allclose(loss2, ref2, rtol=2e-4, atol=1e-4), (loss2, ref2)

    print("KERNEL_OK")
</pallas_src>

<mosaic_0001>
module attributes {stable_mosaic.version = 11 : i64} {
  func.func @_nll_partial_kernel(%arg0: i32, %arg1: memref<8x1024xf32, #tpu.memory_space<vmem>>, %arg2: memref<1x1024xi32, #tpu.memory_space<vmem>>, %arg3: memref<1x128xf32, #tpu.memory_space<vmem>>) attributes {dimension_semantics = [#tpu.dimension_semantics<parallel>], iteration_bounds = array<i64: 2>, scalar_prefetch = 0 : i64, scratch_operands = 0 : i64, tpu.core_type = #tpu.core_type<tc>, window_params = [{transform_indices = @transform_0, window_bounds = array<i64: 8, 1024>}, {transform_indices = @transform_1, window_bounds = array<i64: 1, 1024>}, {transform_indices = @transform_2, window_bounds = array<i64: 1, 128>}]} {
    %c0 = arith.constant 0 : index
    %c0_0 = arith.constant 0 : index
    %0 = vector.load %arg1[%c0, %c0_0] : memref<8x1024xf32, #tpu.memory_space<vmem>>, vector<8x1024xf32>
    %c0_1 = arith.constant 0 : index
    %c0_2 = arith.constant 0 : index
    %1 = vector.load %arg2[%c0_1, %c0_2] : memref<1x1024xi32, #tpu.memory_space<vmem>>, vector<1x1024xi32>
    %c1024_i32 = arith.constant 1024 : i32
    %2 = arith.muli %arg0, %c1024_i32 : i32
    %3 = tpu.iota {dimensions = array<i32: 1>} : vector<1x1024xi32>
    %4 = vector.broadcast %2 : i32 to vector<1x1024xi32>
    %5 = arith.addi %4, %3 : vector<1x1024xi32>
    %c2048_i32 = arith.constant 2048 : i32
    %6 = vector.broadcast %c2048_i32 : i32 to vector<1x1024xi32>
    %7 = arith.cmpi slt, %5, %6 : vector<1x1024xi32>
    %cst = arith.constant 0.000000e+00 : f32
    %8 = vector.shape_cast %7 : vector<1x1024xi1> to vector<1x1024xi1>
    %9 = vector.broadcast %8 : vector<1x1024xi1> to vector<8x1024xi1>
    %10 = vector.broadcast %cst : f32 to vector<8x1024xf32>
    %11 = arith.select %9, %0, %10 : vector<8x1024xi1>, vector<8x1024xf32>
    %cst_3 = arith.constant dense<0xFF800000> : vector<1024xf32>
    %12 = vector.multi_reduction <maximumf>, %11, %cst_3 [0] : vector<8x1024xf32> to vector<1024xf32>
    %13 = vector.shape_cast %12 : vector<1024xf32> to vector<1x1024xf32>
    %14 = vector.broadcast %13 : vector<1x1024xf32> to vector<8x1024xf32>
    %15 = arith.subf %11, %14 : vector<8x1024xf32>
    %16 = math.exp %15 : vector<8x1024xf32>
    %cst_4 = arith.constant dense<0.000000e+00> : vector<1024xf32>
    %17 = vector.multi_reduction <add>, %16, %cst_4 [0] : vector<8x1024xf32> to vector<1024xf32>
    %18 = vector.shape_cast %17 : vector<1024xf32> to vector<1x1024xf32>
    %19 = math.log %18 : vector<1x1024xf32>
    %20 = arith.addf %13, %19 : vector<1x1024xf32>
    %21 = tpu.iota {dimensions = array<i32: 0>} : vector<8x1xi32>
    %22 = vector.broadcast %21 : vector<8x1xi32> to vector<8x1024xi32>
    %23 = vector.broadcast %1 : vector<1x1024xi32> to vector<8x1024xi32>
    %24 = arith.cmpi eq, %22, %23 : vector<8x1024xi32>
    %cst_5 = arith.constant 0.000000e+00 : f32
    %25 = vector.broadcast %cst_5 : f32 to vector<8x1024xf32>
    %26 = arith.select %24, %11, %25 : vector<8x1024xi1>, vector<8x1024xf32>
    %cst_6 = arith.constant dense<0.000000e+00> : vector<1024xf32>
    %27 = vector.multi_reduction <add>, %26, %cst_6 [0] : vector<8x1024xf32> to vector<1024xf32>
    %28 = vector.shape_cast %27 : vector<1024xf32> to vector<1x1024xf32>
    %29 = arith.subf %20, %28 : vector<1x1024xf32>
    %cst_7 = arith.constant 0.000000e+00 : f32
    %30 = vector.broadcast %cst_7 : f32 to vector<1x1024xf32>
    %31 = arith.select %7, %29, %30 : vector<1x1024xi1>, vector<1x1024xf32>
    %32 = vector.shape_cast %31 : vector<1x1024xf32> to vector<1x1x1024xf32>
    %cst_8 = arith.constant dense<0.000000e+00> : vector<1xf32>
    %33 = vector.multi_reduction <add>, %32, %cst_8 [1, 2] : vector<1x1x1024xf32> to vector<1xf32>
    %34 = vector.shape_cast %33 : vector<1xf32> to vector<1x1x1xf32>
    %35 = vector.extract %34[0, 0, 0] : f32 from vector<1x1x1xf32>
    %36 = tpu.iota {dimensions = array<i32: 1>} : vector<1x128xi32>
    %c0_i32 = arith.constant 0 : i32
    %37 = vector.broadcast %c0_i32 : i32 to vector<1x128xi32>
    %38 = arith.cmpi eq, %36, %37 : vector<1x128xi32>
    %cst_9 = arith.constant 0.000000e+00 : f32
    %39 = vector.broadcast %35 : f32 to vector<1x128xf32>
    %40 = vector.broadcast %cst_9 : f32 to vector<1x128xf32>
    %41 = arith.select %38, %39, %40 : vector<1x128xi1>, vector<1x128xf32>
    %c0_10 = arith.constant 0 : index
    %c0_11 = arith.constant 0 : index
    %42 = vector.load %arg3[%c0_10, %c0_11] : memref<1x128xf32, #tpu.memory_space<vmem>>, vector<1x128xf32>
    tpu.vector_store %arg3[%c0_10, %c0_11], %41 {strides = array<i32>} : memref<1x128xf32, #tpu.memory_space<vmem>>, vector<1x128xf32>,
    return
  }
  func.func @transform_0(%arg0: i32) -> (i32, i32) {
    %c0_i32 = arith.constant 0 : i32
    %c0_i32_0 = arith.constant 0 : i32
    return %c0_i32, %arg0 : i32, i32
  }
  func.func @transform_1(%arg0: i32) -> (i32, i32) {
    %c0_i32 = arith.constant 0 : i32
    %c0_i32_0 = arith.constant 0 : i32
    return %c0_i32, %arg0 : i32, i32
  }
  func.func @transform_2(%arg0: i32) -> (i32, i32) {
    %c0_i32 = arith.constant 0 : i32
    %c0_i32_0 = arith.constant 0 : i32
    return %c0_i32, %arg0 : i32, i32
  }
}

</mosaic_0001>

<bundles_post_ra>
// kernel: rule_sequence_labeler_loss.1
= control target key start
LH: loop header
LB: loop body
LE: loop exit
PB: predicated region body
PF: predicated region fallthrough
CT: control target
= control target key end

     0   :  { %7 = vsyncpa [#allocation3], 0  ;;  %s1105_s0 = inlined_call_operand.hbm [shape: f32[8,2048], index: 0, kind: input, shape index: {}]   ;;  %s1106_s1 = inlined_call_operand.vmem [shape: s32[1,2048], index: 1, kind: input, shape index: {}]   ;;  %s1107_s2 = inlined_call_operand.vmem [shape: f32[1,256], index: 2, kind: output, shape index: {}]  }
   0x1   :  { %9 = vsyncpa [#allocation3 + $0x1], 0  ;;  %s761_s9 = smov 0   ;;  %s763_s10 = smov 0  }
   0x2   :  { %s765_s11 = smov 0   ;;  %s767_s12 = smov 0  }
   0x3 LB: > { %s780_s13 = sadd.s32 4294967295, %s743_s12   ;;  %s783_s14 = sadd.s32 1, %s743_s12   ;;  %s743_s12 = sphi %s767_s12, %s1117_s12   ;;  %s739_s11 = sphi %s765_s11, %s1116_s11   ;;  %s735_s10 = sphi %s763_s10, %s1115_s10   ;;  %s731_s9 = sphi %s761_s9, %s1114_s9  }
   0x4   : > { %s19_s15 = ssub.s32 %s743_s12, %s783_s14  ;;  %s22_s16 = sadd.s32 1, %s739_s11 }
   0x5   : > { %p20_p0 = scmp.eq.s32.totalorder %s19_s15, 0  ;;  %p29_p1 = scmp.ne.s32.totalorder %s739_s11, %s735_s10 }
   0x6   : > { %p30_p2 = scmp.eq.s32.totalorder %s743_s12, 0  ;;  %p35_p3 = scmp.ne.s32.totalorder %s735_s10, %s731_s9 }
   0x7   : > { %s793_s17 = scalar_select %p20_p0, %s739_s11, %s22_s16  }
   0x8   : > { %p31_p4 = por %p30_p2, %p29_p1  ;;  %p36_p5 = scmp.eq.s32.totalorder %s780_s13, 0 }
   0x9   : > { %p614_p6 = scmp.lt.s32.totalorder %s743_s12, 2  ;;  %s111_s19 = sand.u32 1, %s739_s11  }
   0xa   : > { %p797_p7 = por %p36_p5, %p35_p3  ;;  %s596_s20 = sshll.u32 %s111_s19, 6 }
   0xb   : > { %s605_s21 = sshll.u32 %s743_s12, 10  ;;  %s115_s25 = scalar_lea.vmem [#allocation2], %s596_s20 }
   0xc   : > { %s806_s24 = scalar_lea.hbm %s1105_s0, %s605_s21  ;;  %s123_s26 = sshll.u32 %s115_s25, 4  ;;  %s808_s26 = int_to_ptr.vmem [resolvable:$true] %s123_s26 }
   0xd   : > { %p810_p8 = pnand %p614_p6, %p31_p4  ;;  %s112_s28 = scalar_lea.sflag [#allocation3], %s111_s19 }
   0xe   : > { %s679_s29 = scalar_lea.hbm %s806_s24, 1024  ;;  %s684_s4 = scalar_lea.hbm %s1105_s0, 2048 }
   0xf   : > { %p680_p11 = scmp.ne.s32.totalorder %s806_s24, %s679_s29  ;;  %p681_p12 = pneg %p810_p8 }
  0x10   : > { %p685_p1 = scmp.lt.u32.totalorder %s806_s24, %s1105_s0  ;;  %p686_p2 = scmp.lt.u32.totalorder %s684_s4, %s679_s29 }
  0x11   : > { %p682_p13 = pnand %p681_p12, %p680_p11  ;;  %p688_p4 = scmp.lt.u32.totalorder %s679_s29, %s806_s24 }
  0x12   : > { %p687_p3 = por %p686_p2, %p685_p1 }
  0x13   : > { %p683_p0 = pneg %p682_p13 }
  0x14   : > { %p689_p5 = por %p688_p4, %p687_p3 }
  0x16   : > { %p690_p6 = pnand %p689_p5, %p683_p0 }
  0x18   : > { %693 = shalt.err (!%p690_p6)
}
  0x19   : > { %s694_s7 = scalar_lea.vmem %s808_s26, 1024  ;;  %s745_s8 = smov [#allocation2]  }
  0x1a   : > { %p695_p11 = scmp.ne.s32.totalorder %s808_s26, %s694_s7  ;;  %s699_s9 = sshll.u32 %s745_s8, 4  ;;  %s700_s9 = int_to_ptr.vmem [resolvable:$false] %s699_s9 }
  0x1b   : > { %s701_s15 = scalar_lea.vmem %s700_s9, 2048  ;;  %p702_p10 = scmp.lt.s32.totalorder %s808_s26, %s700_s9 }
  0x1c   : > { %p697_p13 = pnand %p695_p11, %p681_p12  ;;  %p703_p1 = scmp.lt.s32.totalorder %s701_s15, %s694_s7 }
  0x1e   : > { %p698_p9 = pneg %p697_p13  ;;  %p704_p2 = por %p703_p1, %p702_p10 }
  0x20   : > { %p705_p3 = pnand %p704_p2, %p698_p9 }
  0x22   : > { %708 = shalt.err (!%p705_p3)
}
  0x23   : > { %613 = dma.hbm_to_vmem [thread:$0]  (!%p810_p8), %s806_s24, 1024, %s808_s26, %s112_s28  }
  0x24   : > { %p1110_p0 = scmp.lt.s32.totalorder %s743_s12, 3  ;;  %p1111_p4 = scmp.ge.s32.totalorder %s743_s12, 1 }
  0x26   : > { %p137_p12 = pnand %p1111_p4, %p1110_p0 }
  0x27   : > { %s142_s16 = sand.u32 (!%p137_p12), 1, %s735_s10  }
  0x28   : > { %140 = sbr.rel (%p137_p12) target bundleno = 341 (0x155), region = 28  ;;  %s600_s19 = sshll.u32 (!%p137_p12), %s142_s16, 6 }
  0x29   : > { %s143_s20 = scalar_lea.sflag (!%p137_p12), [#allocation3], %s142_s16  ;;  %s846_s21 = scalar_lea.vmem (!%p137_p12), [#allocation2], %s600_s19 }
  0x2f   : > { %726 = dma.done.wait (%p797_p7), %s143_s20, 1024  }
  0x30   : > { %728 = vsyncadd (%p797_p7), %s143_s20, 4294966272  ;;  %v188_v0 = vlaneseq  ;;  %s602_s22 = sshll.u32 %s780_s13, 10  ;;  %v178_v15 = vld [vmem:[%s846_s21] sm:$0xff]  ;;  %v179_v16 = vld [vmem:[%s846_s21 + $0x8] sm:$0xff]  ;;  %s601_s12 = sshll.u32 %s780_s13, 3 }
  0x31   : > { %v197_v2 = vstv %s602_s22  ;;  %v180_v17 = vld [vmem:[%s846_s21 + $0x10] sm:$0xff]  ;;  %v181_v21 = vld [vmem:[%s846_s21 + $0x18] sm:$0xff]  ;;  %v182_v22 = vld [vmem:[%s846_s21 + $0x20] sm:$0xff]  ;;  %p939_p7 = scmp.lt.s32.totalorder %s601_s12, 15  ;;  %p175_p8 = scmp.lt.s32.totalorder %s780_s13, 1 }
  0x32   : > { %v853_v1 = vand.u32 127, %v188_v0  ;;  %v183_v23 = vld [vmem:[%s846_s21 + $0x28] sm:$0xff]  ;;  %v184_v24 = vld [vmem:[%s846_s21 + $0x30] sm:$0xff]  ;;  %v185_v25 = vld [vmem:[%s846_s21 + $0x38] sm:$0xff]  ;;  %v894_v26 = vshrl.u32 %v188_v0, 7 }
  0x33   : > { %s1119_s12 = smov (!%p939_p7, %s601_s12), 15  ;;  %s1121_s13 = smov (!%p175_p8, %s780_s13), 1 }
  0x34   : > { %v190_v3 = vadd.s32 128, %v853_v1  ;;  %v191_v4 = vadd.s32 256, %v853_v1  ;;  %v192_v5 = vadd.s32 384, %v853_v1  ;;  %v193_v6 = vadd.s32 512, %v853_v1  ;;  %s173_s25 = scalar_lea.vmem %s1106_s1, %s1119_s12  ;;  %s177_s28 = scalar_lea.vmem %s1107_s2, %s1121_s13 }
  0x35   : > { %v194_v7 = vadd.s32 640, %v853_v1  ;;  %v195_v8 = vadd.s32 768, %v853_v1  ;;  %v196_v9 = vadd.s32 896, %v853_v1  ;;  %v863_v10 = vadd.s32 %v197_v2, %v853_v1 }
  0x36   : > { %v865_v11 = vadd.s32 %v197_v2, %v190_v3  ;;  %v867_v12 = vadd.s32 %v197_v2, %v191_v4  ;;  %v869_v13 = vadd.s32 %v197_v2, %v192_v5  ;;  %v871_v14 = vadd.s32 %v197_v2, %v193_v6 }
  0x37   : > { %v876_v18 = vadd.s32 %v197_v2, %v194_v7  ;;  %v878_v19 = vadd.s32 %v197_v2, %v195_v8  ;;  %v880_v20 = vadd.s32 %v197_v2, %v196_v9  ;;  %vm206_vm0 = vcmp.lt.s32.totalorder %v863_v10, 2048 }
  0x38   : > { %vm207_vm1 = vcmp.lt.s32.totalorder %v865_v11, 2048  ;;  %vm208_vm2 = vcmp.lt.s32.totalorder %v867_v12, 2048  ;;  %vm209_vm3 = vcmp.lt.s32.totalorder %v869_v13, 2048  ;;  %vm210_vm4 = vcmp.lt.s32.totalorder %v871_v14, 2048 }
  0x39   : > { %vm211_vm5 = vcmp.lt.s32.totalorder %v876_v18, 2048  ;;  %vm212_vm6 = vcmp.lt.s32.totalorder %v878_v19, 2048  ;;  %vm213_vm7 = vcmp.lt.s32.totalorder %v880_v20, 2048  ;;  %v899_v27 = vsel %vm206_vm0, %v178_v15, 0.0 }
  0x3a   : > { %v903_v28 = vsel %vm207_vm1, %v179_v16, 0.0  ;;  %v907_v29 = vsel %vm208_vm2, %v180_v17, 0.0  ;;  %v912_v30 = vsel %vm209_vm3, %v181_v21, 0.0  ;;  %v916_v31 = vsel %vm210_vm4, %v182_v22, 0.0 }
  0x3b   : > { %v920_v32 = vsel %vm211_vm5, %v183_v23, 0.0  ;;  %v924_v33 = vsel %vm212_vm6, %v184_v24, 0.0  ;;  %v928_v34 = vsel %vm213_vm7, %v185_v25, 0.0  ;;  %v238_v35 = vrot.slane %v899_v27, 4 }
  0x3c   : > { %v244_v36 = vrot.slane %v903_v28, 4  ;;  %v250_v37 = vrot.slane %v907_v29, 4  ;;  %v256_v38 = vrot.slane %v912_v30, 4  ;;  %v262_v39 = vrot.slane %v916_v31, 4 }
  0x3d   : > { %v268_v40 = vrot.slane %v920_v32, 4  ;;  %v274_v41 = vrot.slane %v924_v33, 4  ;;  %v239_v42 = vmax.f32 %v899_v27, %v238_v35  ;;  %v280_v45 = vrot.slane %v928_v34, 4 }
  0x3e   : > { %v245_v43 = vmax.f32 %v903_v28, %v244_v36  ;;  %v251_v44 = vmax.f32 %v907_v29, %v250_v37  ;;  %v257_v46 = vmax.f32 %v912_v30, %v256_v38  ;;  %v263_v47 = vmax.f32 %v916_v31, %v262_v39 }
  0x3f   : > { %v269_v48 = vmax.f32 %v920_v32, %v268_v40  ;;  %v275_v49 = vmax.f32 %v924_v33, %v274_v41  ;;  %v240_v50 = vrot.slane %v239_v42, 2  ;;  %v281_v53 = vmax.f32 %v928_v34, %v280_v45  ;;  %v186_v40 = vld [vmem:[%s173_s25] sm:$0xff] }
  0x40   : > { %v246_v51 = vrot.slane %v245_v43, 2  ;;  %v252_v52 = vrot.slane %v251_v44, 2  ;;  %v258_v54 = vrot.slane %v257_v46, 2  ;;  %v264_v55 = vrot.slane %v263_v47, 2 }
  0x41   : > { %v270_v56 = vrot.slane %v269_v48, 2  ;;  %v276_v57 = vrot.slane %v275_v49, 2  ;;  %v241_v58 = vmax.f32 %v239_v42, %v240_v50  ;;  %v282_v61 = vrot.slane %v281_v53, 2 }
  0x42   : > { %v247_v59 = vmax.f32 %v245_v43, %v246_v51  ;;  %v253_v60 = vmax.f32 %v251_v44, %v252_v52  ;;  %v259_v62 = vmax.f32 %v257_v46, %v258_v54  ;;  %v265_v63 = vmax.f32 %v263_v47, %v264_v55 }
  0x43   : > { %v271_v0 = vmax.f32 %v269_v48, %v270_v56  ;;  %v277_v2 = vmax.f32 %v275_v49, %v276_v57  ;;  %v242_v3 = vrot.slane %v241_v58, 1  ;;  %v283_v6 = vmax.f32 %v281_v53, %v282_v61 }
  0x44   : > { %v248_v4 = vrot.slane %v247_v59, 1  ;;  %v254_v5 = vrot.slane %v253_v60, 1  ;;  %v260_v7 = vrot.slane %v259_v62, 1  ;;  %v266_v8 = vrot.slane %v265_v63, 1 }
  0x45   : > { %v272_v9 = vrot.slane %v271_v0, 1  ;;  %v278_v15 = vrot.slane %v277_v2, 1  ;;  %v962_v16 = vmax.f32 %v241_v58, %v242_v3  ;;  %v284_v22 = vrot.slane %v283_v6, 1 }
  0x46   : > { %v964_v17 = vmax.f32 %v247_v59, %v248_v4  ;;  %v966_v21 = vmax.f32 %v253_v60, %v254_v5  ;;  %v968_v23 = vmax.f32 %v259_v62, %v260_v7  ;;  %v970_v24 = vmax.f32 %v265_v63, %v266_v8 }
  0x47   : > { %v972_v25 = vmax.f32 %v271_v0, %v272_v9  ;;  %v974_v35 = vmax.f32 %v277_v2, %v278_v15  ;;  %v976_v36 = vmax.f32 %v283_v6, %v284_v22  ;;  %v286_v37 = vsub.f32 %v899_v27, %v962_v16 }
  0x48   : > { %v287_v38 = vsub.f32 %v903_v28, %v964_v17  ;;  %v288_v39 = vsub.f32 %v907_v29, %v966_v21  ;;  %v289_v41 = vsub.f32 %v912_v30, %v968_v23  ;;  %v290_v42 = vsub.f32 %v916_v31, %v970_v24 }
  0x49   : > { %v291_v43 = vsub.f32 %v920_v32, %v972_v25  ;;  %v292_v44 = vsub.f32 %v924_v33, %v974_v35  ;;  %v293_v45 = vsub.f32 %v928_v34, %v976_v36  ;;  %v294_v46 = vmul.f32 1.442695, %v286_v37 }
  0x4a   : > { %v296_v47 = vmul.f32 1.442695, %v287_v38  ;;  %v298_v48 = vmul.f32 1.442695, %v288_v39  ;;  %v300_v49 = vmul.f32 1.442695, %v289_v41 }
  0x4b   : > { %v302_v50 = vmul.f32 1.442695, %v290_v42  ;;  %v304_v51 = vmul.f32 1.442695, %v291_v43  ;;  %647 = vpow2.f32 %v294_v46  ;;  %v306_v52 = vmul.f32 1.442695, %v292_v44 }
  0x4c   : > { %v308_v53 = vmul.f32 1.442695, %v293_v45  ;;  %v386_v54 = vsub.s32 0, %v894_v26  ;;  %649 = vpow2.f32 %v296_v47  ;;  %v390_v55 = vsub.s32 1, %v894_v26 }
  0x4d   : > { %v394_v56 = vsub.s32 2, %v894_v26  ;;  %v398_v57 = vsub.s32 3, %v894_v26  ;;  %651 = vpow2.f32 %v298_v48  ;;  %v402_v59 = vsub.s32 4, %v894_v26 }
  0x4e   : > { %v387_v58 = vrot.slane %v186_v40, %v386_v54  ;;  %v406_v60 = vsub.s32 5, %v894_v26  ;;  %653 = vpow2.f32 %v300_v49  ;;  %v391_v61 = vrot.slane %v186_v40, %v390_v55 }
  0x4f   : > { %v395_v62 = vrot.slane %v186_v40, %v394_v56  ;;  %v399_v63 = vrot.slane %v186_v40, %v398_v57  ;;  %655 = vpow2.f32 %v302_v50  ;;  %v403_v0 = vrot.slane %v186_v40, %v402_v59 }
  0x50   : > { %v407_v2 = vrot.slane %v186_v40, %v406_v60  ;;  %657 = vpow2.f32 %v304_v51  ;;  %vm416_vm8 = vcmp.eq.s32.totalorder %v894_v26, %v387_v58  ;;  %vm417_vm9 = vcmp.eq.s32.totalorder %v894_v26, %v391_v61 }
  0x51   : > { %659 = vpow2.f32 %v306_v52  ;;  %v410_v3 = vsub.s32 6, %v894_v26  ;;  %vm418_vm10 = vcmp.eq.s32.totalorder %v894_v26, %v395_v62  ;;  %vm419_vm11 = vcmp.eq.s32.totalorder %v894_v26, %v399_v63 }
  0x52   : > { %661 = vpow2.f32 %v308_v53  ;;  %v414_v4 = vsub.s32 7, %v894_v26  ;;  %vm420_vm12 = vcmp.eq.s32.totalorder %v894_v26, %v403_v0  ;;  %vm421_vm13 = vcmp.eq.s32.totalorder %v894_v26, %v407_v2 }
  0x53   : > { %v424_v5 = vsel %vm416_vm8, %v899_v27, 0.0  ;;  %v425_v6 = vsel %vm417_vm9, %v903_v28, 0.0  ;;  %v426_v7 = vsel %vm418_vm10, %v907_v29, 0.0  ;;  %v427_v8 = vsel %vm419_vm11, %v912_v30, 0.0 }
  0x54   : > { %v1013_v9 = vsel %vm420_vm12, %v916_v31, 0.0  ;;  %v1015_v22 = vrot.slane %v186_v40, %v410_v3  ;;  %v1018_v37 = vsel %vm421_vm13, %v920_v32, 0.0  ;;  %v432_v38 = vrot.slane %v424_v5, 4 }
  0x55   : > { %v648_v15 = vpop.eup %647  ;;  %v438_v39 = vrot.slane %v425_v6, 4  ;;  %v1020_v27 = vrot.slane %v186_v40, %v414_v4  ;;  %v444_v28 = vrot.slane %v426_v7, 4  ;;  %v450_v43 = vrot.slane %v427_v8, 4 }
  0x56   : > { %v650_v41 = vpop.eup %649  ;;  %v310_v42 = vrot.slane %v648_v15, 4  ;;  %v433_v30 = vadd.f32 %v432_v38, %v424_v5  ;;  %v456_v31 = vrot.slane %v1013_v9, 4  ;;  %vm422_vm14 = vcmp.eq.s32.totalorder %v894_v26, %v1015_v22 }
  0x57   : > { %v652_v29 = vpop.eup %651  ;;  %v316_v44 = vrot.slane %v650_v41, 4  ;;  %v1022_v45 = vadd.f32 %v438_v39, %v425_v6  ;;  %v1025_v32 = vadd.f32 %v444_v28, %v426_v7  ;;  %v1028_v53 = vadd.f32 %v450_v43, %v427_v8 }
  0x58   : > { %v654_v46 = vpop.eup %653  ;;  %v311_v47 = vadd.f32 %v648_v15, %v310_v42  ;;  %v322_v48 = vrot.slane %v652_v29, 4  ;;  %v434_v52 = vrot.slane %v433_v30, 2  ;;  %vm423_vm15 = vcmp.eq.s32.totalorder %v894_v26, %v1020_v27 }
  0x59   : > { %v656_v50 = vpop.eup %655  ;;  %v317_v51 = vadd.f32 %v650_v41, %v316_v44  ;;  %v328_v40 = vrot.slane %v654_v46, 4  ;;  %v440_v58 = vrot.slane %v1022_v45, 2  ;;  %v446_v63 = vrot.slane %v1025_v32, 2 }
  0x5a   : > { %v658_v54 = vpop.eup %657  ;;  %v312_v55 = vrot.slane %v311_v47, 2  ;;  %v323_v56 = vadd.f32 %v652_v29, %v322_v48  ;;  %v334_v57 = vrot.slane %v656_v50, 4  ;;  %vm496_vm8 = vcmask 1040384  }
  0x5b   : > { %v660_v59 = vpop.eup %659  ;;  %v318_v60 = vrot.slane %v317_v51, 2  ;;  %v329_v61 = vadd.f32 %v654_v46, %v328_v40  ;;  %v340_v62 = vrot.slane %v658_v54, 4 }
  0x5c   : > { %v662_v0 = vpop.eup %661  ;;  %v313_v2 = vadd.f32 %v312_v55, %v311_v47  ;;  %v324_v3 = vrot.slane %v323_v56, 2  ;;  %v335_v4 = vadd.f32 %v656_v50, %v334_v57  ;;  %v346_v5 = vrot.slane %v660_v59, 4 }
  0x5d   : > { %v319_v6 = vadd.f32 %v318_v60, %v317_v51  ;;  %v330_v7 = vrot.slane %v329_v61, 2  ;;  %v341_v8 = vadd.f32 %v658_v54, %v340_v62  ;;  %v352_v15 = vrot.slane %v662_v0, 4 }
  0x5e   : > { %v314_v38 = vrot.slane %v313_v2, 1  ;;  %v325_v39 = vadd.f32 %v324_v3, %v323_v56  ;;  %v336_v41 = vrot.slane %v335_v4, 2  ;;  %v347_v42 = vadd.f32 %v660_v59, %v346_v5 }
  0x5f   : > { %v320_v28 = vrot.slane %v319_v6, 1  ;;  %v331_v43 = vadd.f32 %v330_v7, %v329_v61  ;;  %v342_v29 = vrot.slane %v341_v8, 2  ;;  %v353_v44 = vadd.f32 %v662_v0, %v352_v15 }
  0x60   : > { %v315_v46 = vadd.f32 %v314_v38, %v313_v2  ;;  %v326_v47 = vrot.slane %v325_v39, 1  ;;  %v337_v48 = vadd.f32 %v336_v41, %v335_v4  ;;  %v348_v50 = vrot.slane %v347_v42, 2 }
  0x61   : > { %v321_v40 = vadd.f32 %v320_v28, %v319_v6  ;;  %v332_v55 = vrot.slane %v331_v43, 1  ;;  %v343_v57 = vadd.f32 %v342_v29, %v341_v8  ;;  %v354_v49 = vrot.slane %v353_v44, 2 }
  0x62   : > { %v327_v51 = vadd.f32 %v326_v47, %v325_v39  ;;  %v338_v60 = vrot.slane %v337_v48, 1  ;;  %v349_v54 = vadd.f32 %v348_v50, %v347_v42  ;;  %663 = vlog2.f32 %v315_v46 }
  0x63   : > { %v333_v62 = vadd.f32 %v332_v55, %v331_v43  ;;  %v344_v56 = vrot.slane %v343_v57, 1  ;;  %v355_v3 = vadd.f32 %v354_v49, %v353_v44  ;;  %665 = vlog2.f32 %v321_v40 }
  0x64   : > { %v339_v59 = vadd.f32 %v338_v60, %v337_v48  ;;  %v350_v61 = vrot.slane %v349_v54, 1  ;;  %667 = vlog2.f32 %v327_v51  ;;  %v435_v0 = vadd.f32 %v434_v52, %v433_v30 }
  0x65   : > { %v345_v2 = vadd.f32 %v344_v56, %v343_v57  ;;  %v356_v5 = vrot.slane %v355_v3, 1  ;;  %669 = vlog2.f32 %v333_v62  ;;  %v441_v4 = vadd.f32 %v440_v58, %v1022_v45 }
  0x66   : > { %v351_v6 = vadd.f32 %v350_v61, %v349_v54  ;;  %671 = vlog2.f32 %v339_v59  ;;  %v430_v7 = vsel %vm422_vm14, %v924_v33, 0.0  ;;  %v447_v8 = vadd.f32 %v446_v63, %v1025_v32 }
  0x67   : > { %v357_v49 = vadd.f32 %v356_v5, %v355_v3  ;;  %673 = vlog2.f32 %v345_v2  ;;  %v431_v30 = vsel %vm423_vm15, %v928_v34, 0.0  ;;  %v452_v52 = vrot.slane %v1028_v53, 2 }
  0x68   : > { %675 = vlog2.f32 %v351_v6  ;;  %v436_v45 = vrot.slane %v435_v0, 1  ;;  %v457_v58 = vadd.f32 %v456_v31, %v1013_v9  ;;  %v1113_v33 = vrot.slane %v1018_v37, 4 }
  0x69   : > { %677 = vlog2.f32 %v357_v49  ;;  %v442_v32 = vrot.slane %v441_v4, 1  ;;  %v453_v63 = vadd.f32 %v452_v52, %v1028_v53  ;;  %v468_v15 = vrot.slane %v430_v7, 4 }
  0x6a   : > { %v463_v22 = vadd.f32 %v1113_v33, %v1018_v37  ;;  %v448_v38 = vrot.slane %v447_v8, 1  ;;  %v458_v26 = vrot.slane %v457_v58, 2  ;;  %v474_v27 = vrot.slane %v431_v30, 4 }
  0x6b   : > { %v469_v39 = vadd.f32 %v468_v15, %v430_v7  ;;  %v454_v42 = vrot.slane %v453_v63, 1  ;;  %v437_v44 = vadd.f32 %v436_v45, %v435_v0  ;;  %v443_v37 = vadd.f32 %v442_v32, %v441_v4 }
  0x6c   : > { %v464_v34 = vrot.slane %v463_v22, 2  ;;  %v664_v41 = vpop.eup %663  ;;  %v459_v28 = vadd.f32 %v458_v26, %v457_v58  ;;  %v475_v29 = vadd.f32 %v474_v27, %v431_v30  ;;  %v449_v53 = vadd.f32 %v448_v38, %v447_v8 }
  0x6d   : > { %v666_v9 = vpop.eup %665  ;;  %v359_v31 = vmul.f32 0.6931472, %v664_v41  ;;  %v470_v46 = vrot.slane %v469_v39, 2  ;;  %v455_v59 = vadd.f32 %v454_v42, %v453_v63 }
  0x6e   : > { %v465_v43 = vadd.f32 %v464_v34, %v463_v22  ;;  %v668_v47 = vpop.eup %667  ;;  %v361_v48 = vmul.f32 0.6931472, %v666_v9  ;;  %v460_v50 = vrot.slane %v459_v28, 1  ;;  %v476_v40 = vrot.slane %v475_v29, 2 }
  0x6f   : > { %v670_v55 = vpop.eup %669  ;;  %v363_v57 = vmul.f32 0.6931472, %v668_v47  ;;  %v374_v51 = vadd.f32 %v359_v31, %v962_v16  ;;  %v471_v54 = vadd.f32 %v470_v46, %v469_v39 }
  0x70   : > { %v466_v60 = vrot.slane %v465_v43, 1  ;;  %v672_v62 = vpop.eup %671  ;;  %v365_v56 = vmul.f32 0.6931472, %v670_v55  ;;  %v375_v3 = vadd.f32 %v361_v48, %v964_v17  ;;  %v461_v61 = vadd.f32 %v460_v50, %v459_v28 }
  0x71   : > { %v674_v0 = vpop.eup %673  ;;  %v367_v2 = vmul.f32 0.6931472, %v672_v62  ;;  %v376_v5 = vadd.f32 %v363_v57, %v966_v21  ;;  %v472_v4 = vrot.slane %v471_v54, 1  ;;  %v477_v6 = vadd.f32 %v476_v40, %v475_v29 }
  0x72   : > { %v676_v7 = vpop.eup %675  ;;  %v369_v8 = vmul.f32 0.6931472, %v674_v0  ;;  %v377_v49 = vadd.f32 %v365_v56, %v968_v23  ;;  %v480_v30 = vsub.f32 %v374_v51, %v437_v44  ;;  %v481_v16 = vsub.f32 %v375_v3, %v443_v37 }
  0x73   : > { %v678_v52 = vpop.eup %677  ;;  %v371_v45 = vmul.f32 0.6931472, %v676_v7  ;;  %v378_v58 = vadd.f32 %v367_v2, %v970_v24  ;;  %v467_v33 = vadd.f32 %v466_v60, %v465_v43  ;;  %v478_v17 = vrot.slane %v477_v6, 1 }
  0x74   : > { %v373_v22 = vmul.f32 0.6931472, %v678_v52  ;;  %v379_v32 = vadd.f32 %v369_v8, %v972_v25  ;;  %v482_v63 = vsub.f32 %v376_v5, %v449_v53  ;;  %v483_v15 = vsub.f32 %v377_v49, %v455_v59 }
  0x75   : > { %v380_v21 = vadd.f32 %v371_v45, %v974_v35  ;;  %v473_v38 = vadd.f32 %v472_v4, %v471_v54  ;;  %v484_v26 = vsub.f32 %v378_v58, %v461_v61  ;;  %v488_v23 = vsel %vm206_vm0, %v480_v30, 0.0 }
  0x76   : > { %v479_v34 = vadd.f32 %v478_v17, %v477_v6  ;;  %v489_v27 = vsel %vm207_vm1, %v481_v16, 0.0  ;;  %v490_v24 = vsel %vm208_vm2, %v482_v63, 0.0  ;;  %v381_v39 = vadd.f32 %v373_v22, %v976_v36 }
  0x77   : > { %v485_v41 = vsub.f32 %v379_v32, %v467_v33  ;;  %v491_v25 = vsel %vm209_vm3, %v483_v15, 0.0  ;;  %v497_v35 = vsel %vm496_vm8, %v488_v23, 0.0  ;;  %v498_v42 = vsel %vm496_vm8, %v489_v27, 0.0 }
  0x78   : > { %v500_v10 = vsel %vm496_vm8, %v490_v24, 0.0  ;;  %v486_v28 = vsub.f32 %v380_v21, %v473_v38  ;;  %v492_v11 = vsel %vm210_vm4, %v484_v26, 0.0  ;;  %v499_v43 = vadd.f32 %v498_v42, %v497_v35 }
  0x79   : > { %v502_v12 = vsel %vm496_vm8, %v491_v25, 0.0  ;;  %v487_v29 = vsub.f32 %v381_v39, %v479_v34  ;;  %v493_v36 = vsel %vm211_vm5, %v485_v41, 0.0  ;;  %v504_v13 = vsel %vm496_vm8, %v492_v11, 0.0 }
  0x7a   : > { %v501_v9 = vadd.f32 %v500_v10, %v499_v43  ;;  %v494_v31 = vsel %vm212_vm6, %v486_v28, 0.0  ;;  %v506_v37 = vsel %vm496_vm8, %v493_v36, 0.0  ;;  %vm521_vm0 = vcmp.eq.s32.totalorder %v853_v1, 0 }
  0x7b   : > { %v495_v14 = vsel %vm213_vm7, %v487_v29, 0.0  ;;  %v508_v47 = vsel %vm496_vm8, %v494_v31, 0.0 }
  0x7c   : > { %v503_v44 = vadd.f32 %v502_v12, %v501_v9  ;;  %v510_v18 = vsel %vm496_vm8, %v495_v14, 0.0 }
  0x7e   : > { %v505_v46 = vadd.f32 %v504_v13, %v503_v44 }
  0x80   : > { %v507_v48 = vadd.f32 %v506_v37, %v505_v46 }
  0x82   : > { %v509_v53 = vadd.f32 %v508_v47, %v507_v48 }
  0x84   : > { %v511_v50 = vadd.f32 %v510_v18, %v509_v53 }
  0x86   : > { %512 = vadd.xlane.f32.xlu0 %v511_v50 }
 0x113   : > { %v513_v40 = vpop.xlane.xlu0 %512 }
 0x114   : > { %v514_v19 = vrot.slane %v513_v40, 4 }
 0x116   : > { %v515_v55 = vadd.f32 %v514_v19, %v513_v40 }
 0x118   : > { %v516_v57 = vrot.slane %v515_v55, 2 }
 0x11a   : > { %v517_v51 = vadd.f32 %v516_v57, %v515_v55 }
 0x11c   : > { %v518_v60 = vrot.slane %v517_v51, 1 }
 0x11e   : > { %v519_v54 = vadd.f32 %v518_v60, %v517_v51 }
 0x120   : > { %606 = vpush %v519_v54 }
 0x151   : > { %s607_s29 = spop %606 }
 0x152   : > { %v522_v20 = vstv %s607_s29 }
 0x153   : > { %v523_v62 = vsel %vm521_vm0, %v522_v20, 0.0 }
 0x154   : > { %524 = vst [vmem:[%s177_s28] sm:$0x1] %v523_v62 }
 0x155 PF: > { %p12_p9 = scmp.ge.s32.totalorder %s783_s14, 4   ;;  %s1114_s9 = smov %s735_s10 }
 0x156   : > { %s1115_s10 = smov %s739_s11  ;;  %s1116_s11 = smov %s793_s17 }
 0x157   : > { %s1117_s12 = smov %s783_s14  ;;  %14 = sbr.rel (!%p12_p9) target bundleno = 3 (0x3), region = 71 }
 0x15e   :  { %542 = vsyncpa [#allocation3], 1 }
 0x15f   :  { %544 = vsyncpa [#allocation3 + $0x1], 1 }

</bundles_post_ra>
